<compile_context>
chip_gen: v7x
topology: tpu7x:2x2x1
jax: 0.10.0
libtpu: 0.0.40
codegen_flags: <defaults>
</compile_context>

<pallas_src>
import functools

import jax
import jax.numpy as jnp
from jax import lax
from jax.experimental import pallas as pl
from jax.experimental.pallas import tpu as pltpu


# --------------------------------------------------------------------------- kernels
def _flash_fwd_kernel(*refs, inv_temp, has_mask, emit_lse, compute_dtype):
    # refs: q, k, v, [mask], out, [lse], m_scratch, l_scratch, acc_scratch
    q_ref, k_ref, v_ref = refs[0], refs[1], refs[2]
    i = 3
    mask_ref = None
    if has_mask:
        mask_ref = refs[i]
        i += 1
    out_ref = refs[i]
    i += 1
    lse_ref = None
    if emit_lse:
        lse_ref = refs[i]
        i += 1
    m_ref, l_ref, acc_ref = refs[i], refs[i + 1], refs[i + 2]

    ki = pl.program_id(2)

    @pl.when(ki == 0)
    def _init():
        m_ref[...] = jnp.full_like(m_ref, -jnp.inf)
        l_ref[...] = jnp.zeros_like(l_ref)
        acc_ref[...] = jnp.zeros_like(acc_ref)

    cdt = q_ref.dtype if compute_dtype is None else compute_dtype
    # Scale the (tq, Dk) q tile, not the (tq, tk) score tile.
    q = (q_ref[0] * inv_temp).astype(cdt)
    k = k_ref[0].astype(cdt)

    # scores = q_scaled @ k^T, contraction on last dims (no k transpose / relayout).
    s = lax.dot_general(
        q, k, (((1,), (1,)), ((), ())), preferred_element_type=jnp.float32
    )

    if has_mask:
        # mask_ref holds "is_masked" int8 at its natural extents
        # ((tq,tk), (1,tk), (tq,1) or (1,1)); jnp.where broadcasts in-kernel.
        s = jnp.where(mask_ref[0] != 0, jnp.float32(-1e9), s)

    # Online softmax in f32.  For small head dims the single EUP (one exp per
    # score element) is the binding unit, so the extra VPU ops below are filler.
    m_prev = m_ref[...]                                  # (tq, 1) f32
    m_new = jnp.maximum(m_prev, jnp.max(s, axis=-1, keepdims=True))
    alpha = jnp.exp(m_prev - m_new)                      # (tq, 1)
    p = jnp.exp(s - m_new)                               # (tq, tk) f32
    l_ref[...] = alpha * l_ref[...] + jnp.sum(p, axis=-1, keepdims=True)
    acc_ref[...] = alpha * acc_ref[...] + jnp.dot(
        p.astype(cdt), v_ref[0].astype(cdt), preferred_element_type=jnp.float32
    )
    m_ref[...] = m_new

    @pl.when(ki == pl.num_programs(2) - 1)
    def _finalize():
        # Normalize the (tq, Dv) accumulator (not the (tq, tk) prob tile);
        # approx reciprocal rides the otherwise-idle EUP slot.
        inv_l = pl.reciprocal(l_ref[...], approx=True)
        out_ref[0] = (acc_ref[...] * inv_l).astype(out_ref.dtype)
        if emit_lse:
            # Single side output lse = m + log(l); written once per q tile.
            lse_ref[0] = m_ref[...] + jnp.log(l_ref[...])


def _attn_tile_kernel(*refs, inv_temp, has_mask, compute_dtype):
    # refs: q, k, lse, [mask], attn
    if has_mask:
        q_ref, k_ref, lse_ref, mask_ref, attn_ref = refs
    else:
        q_ref, k_ref, lse_ref, attn_ref = refs
        mask_ref = None

    cdt = q_ref.dtype if compute_dtype is None else compute_dtype
    q = (q_ref[0] * inv_temp).astype(cdt)
    k = k_ref[0].astype(cdt)
    s = lax.dot_general(
        q, k, (((1,), (1,)), ((), ())), preferred_element_type=jnp.float32
    )
    if has_mask:
        s = jnp.where(mask_ref[0] != 0, jnp.float32(-1e9), s)

    # attn = exp(s - lse); lse folds the normalizer (no reciprocal / full-tile mul).
    attn_ref[0] = jnp.exp(s - lse_ref[0]).astype(attn_ref.dtype)


# --------------------------------------------------------------------------- wrapper
def _pick_tile(dim, candidates):
    for c in candidates:
        if dim % c == 0:
            return c
    return dim  # full dim always satisfies the (8,128) block constraint


def scaled_dot_product_attention(q, k, v, temperature, mask=None,
                                 return_attn=True, use_bf16_matmul=False,
                                 kv_buffer_count=2):
    """q,k,v: (B, H, L, D).  mask: broadcastable to (B, H, Lq, Lk) or None.

    Returns (output (B,H,Lq,Dv), attn (B,H,Lq,Lk)) like the PyTorch module.
    return_attn=False skips materializing the attention matrix and all side
    outputs (flash-style fast path, returns (output, None)).
    use_bf16_matmul=True feeds the MXU bf16 operands (f32 accumulation)."""
    B, H, Lq, Dk = q.shape
    Lk = k.shape[2]
    Dv = v.shape[3]
    N = B * H

    qf = q.reshape(N, Lq, Dk)
    kf = k.reshape(N, Lk, Dk)
    vf = v.reshape(N, Lk, Dv)

    # tq capped at 256 (keeps the f32 (tq,tk) intermediate <= 512 KiB and leaves
    # headroom under v7x's 64 MiB/TC VMEM); tk up to 512.
    tq = _pick_tile(Lq, (256, 128))
    tk = _pick_tile(Lk, (512, 256, 128))
    nq = Lq // tq
    nk = Lk // tk

    inv_temp = 1.0 / float(temperature)
    compute_dtype = jnp.bfloat16 if use_bf16_matmul else None

    def kv_spec(block_shape, index_map):
        # Optionally deepen KV-side prefetch when the per-ki DMA is exposed.
        if kv_buffer_count != 2:
            return pl.BlockSpec(block_shape, index_map,
                                pipeline_mode=pl.Buffered(kv_buffer_count))
        return pl.BlockSpec(block_shape, index_map)

    q_spec = pl.BlockSpec((1, tq, Dk), lambda n, qi, ki: (n, qi, 0))
    k_spec = kv_spec((1, tk, Dk), lambda n, qi, ki: (n, ki, 0))
    v_spec = kv_spec((1, tk, Dv), lambda n, qi, ki: (n, ki, 0))

    inputs = [qf, kf, vf]
    in_specs = [q_spec, k_spec, v_spec]

    has_mask = mask is not None
    maskf = None
    mask_spec = None
    if has_mask:
        m4 = jnp.asarray(mask)
        if m4.ndim < 4:
            m4 = m4.reshape((1,) * (4 - m4.ndim) + m4.shape)
        MB, MH, MQ, MK = m4.shape
        if MB not in (1, B) or MH not in (1, H) or MQ not in (1, Lq) or MK not in (1, Lk):
            raise ValueError(
                f"mask shape {m4.shape} not broadcastable to {(B, H, Lq, Lk)}")
        # Keep the mask at its natural extents -- no O(B*Lq*Lk) int8
        # materialization.  Size-1 Lq/Lk dims stay size-1 and broadcast in-kernel.
        maskf = (m4 == 0).astype(jnp.int8).reshape(MB * MH, MQ, MK)
        mq_blk = tq if MQ == Lq else 1
        mk_blk = tk if MK == Lk else 1

        def mask_index(n, qi, ki):
            b = (n // H) if MB > 1 else 0
            h = (n % H) if MH > 1 else 0
            return (b * MH + h, qi if MQ > 1 else 0, ki if MK > 1 else 0)

        mask_spec = kv_spec((1, mq_blk, mk_blk), mask_index)
        inputs.append(maskf)
        in_specs.append(mask_spec)

    compiler_params = pltpu.CompilerParams(
        # kv axis last + "arbitrary" (reduction); N and nq are parallel so the
        # grid can shard across the 2 TensorCores on v7x megacore.
        dimension_semantics=("parallel", "parallel", "arbitrary"),
        # Working set at tq<=256, tk<=512 is a few MiB; 32 MiB leaves headroom
        # for Mosaic spill scratch on v7x (64 MiB/TC) and is safe on v5e/v6e.
        vmem_limit_bytes=32 * 1024 * 1024,
    )

    flash_kernel = functools.partial(
        _flash_fwd_kernel, inv_temp=inv_temp, has_mask=has_mask,
        emit_lse=return_attn, compute_dtype=compute_dtype)

    scratch_shapes = [
        pltpu.VMEM((tq, 1), jnp.float32),    # running row max m
        pltpu.VMEM((tq, 1), jnp.float32),    # running row sum l
        pltpu.VMEM((tq, Dv), jnp.float32),   # f32 output accumulator
    ]

    out_spec = pl.BlockSpec((1, tq, Dv), lambda n, qi, ki: (n, qi, 0))
    if return_attn:
        out_shape = (jax.ShapeDtypeStruct((N, Lq, Dv), q.dtype),
                     jax.ShapeDtypeStruct((N, Lq, 1), jnp.float32))
        out_specs = [out_spec,
                     pl.BlockSpec((1, tq, 1), lambda n, qi, ki: (n, qi, 0))]
    else:
        out_shape = jax.ShapeDtypeStruct((N, Lq, Dv), q.dtype)
        out_specs = out_spec

    res = pl.pallas_call(
        flash_kernel,
        out_shape=out_shape,
        grid_spec=pltpu.PrefetchScalarGridSpec(
            num_scalar_prefetch=0,
            grid=(N, nq, nk),
            in_specs=in_specs,
            out_specs=out_specs,
            scratch_shapes=scratch_shapes),
        compiler_params=compiler_params,
    )(*inputs)

    if not return_attn:
        return res.reshape(B, H, Lq, Dv), None

    out_f, lse_f = res
    out = out_f.reshape(B, H, Lq, Dv)

    # Second (optional) pass: reconstruct attn = exp(s - lse) tile-by-tile.
    # Only this pass pays the O(N*Lq*Lk) HBM write.
    attn_kernel = functools.partial(
        _attn_tile_kernel, inv_temp=inv_temp, has_mask=has_mask,
        compute_dtype=compute_dtype)
    attn_inputs = [qf, kf, lse_f]
    attn_in_specs = [q_spec, k_spec,
                     pl.BlockSpec((1, tq, 1), lambda n, qi, ki: (n, qi, 0))]
    if has_mask:
        attn_inputs.append(maskf)
        attn_in_specs.append(mask_spec)

    attn_f = pl.pallas_call(
        attn_kernel,
        out_shape=jax.ShapeDtypeStruct((N, Lq, Lk), q.dtype),
        grid_spec=pltpu.PrefetchScalarGridSpec(
            num_scalar_prefetch=0,
            grid=(N, nq, nk),
            in_specs=attn_in_specs,
            out_specs=pl.BlockSpec((1, tq, tk), lambda n, qi, ki: (n, qi, ki))),
        compiler_params=pltpu.CompilerParams(
            dimension_semantics=("parallel", "parallel", "parallel"),
            vmem_limit_bytes=32 * 1024 * 1024),
    )(*attn_inputs)

    return out, attn_f.reshape(B, H, Lq, Lk)


# --------------------------------------------------------------------------- reference / demo
def _reference(q, k, v, temperature, mask=None):
    attn = jnp.einsum("bhqd,bhkd->bhqk", q / temperature, k)
    if mask is not None:
        attn = jnp.where(mask == 0, -1e9, attn)
    attn = jax.nn.softmax(attn, axis=-1)
    out = jnp.einsum("bhqk,bhkd->bhqd", attn, v)
    return out, attn


if __name__ == "__main__":
    # ---- Test 1: small module-sized shapes, full (Lq, Lk) causal mask --------
    B, H, Lq, Lk, Dk, Dv = 2, 2, 8, 8, 16, 16
    temperature = float(Dk) ** 0.5
    kq, kk, kvk = jax.random.split(jax.random.PRNGKey(0), 3)
    q = jax.random.normal(kq, (B, H, Lq, Dk), dtype=jnp.float32)
    k = jax.random.normal(kk, (B, H, Lk, Dk), dtype=jnp.float32)
    v = jax.random.normal(kvk, (B, H, Lk, Dv), dtype=jnp.float32)
    causal = jnp.tril(jnp.ones((Lq, Lk), dtype=jnp.int32))[None, None, :, :]

    ref_out, ref_attn = _reference(q, k, v, temperature, mask=causal)

    out, attn = scaled_dot_product_attention(q, k, v, temperature, mask=causal)
    jax.block_until_ready((out, attn))
    assert jnp.allclose(out, ref_out, atol=1e-2, rtol=1e-2)
    assert jnp.allclose(attn, ref_attn, atol=1e-4, rtol=1e-4)

    # Fast path: no attention matrix, no lse/m/l HBM outputs.
    out_fast, attn_none = scaled_dot_product_attention(
        q, k, v, temperature, mask=causal, return_attn=False)
    jax.block_until_ready(out_fast)
    assert attn_none is None
    assert jnp.allclose(out_fast, ref_out, atol=1e-2, rtol=1e-2)

    # No-mask path.
    ref_out_nm, ref_attn_nm = _reference(q, k, v, temperature, mask=None)
    out_nm, attn_nm = scaled_dot_product_attention(q, k, v, temperature, mask=None)
    jax.block_until_ready((out_nm, attn_nm))
    assert jnp.allclose(out_nm, ref_out_nm, atol=1e-2, rtol=1e-2)
    assert jnp.allclose(attn_nm, ref_attn_nm, atol=1e-4, rtol=1e-4)

    # Opt-in bf16 MXU path (changes numerics slightly; biggest win on v5e).
    out_bf, attn_bf = scaled_dot_product_attention(
        q, k, v, temperature, mask=causal, use_bf16_matmul=True)
    jax.block_until_ready((out_bf, attn_bf))
    assert jnp.allclose(out_bf, ref_out, atol=6e-2, rtol=6e-2)

    # ---- Test 2: tiled shapes, key-padding mask kept at natural (B,1,1,Lk) ---
    B2, H2, Lq2, Lk2, D2 = 1, 2, 512, 768, 64
    temperature2 = float(D2) ** 0.5
    kk1, kk2, kk3 = jax.random.split(jax.random.PRNGKey(1), 3)
    q2 = jax.random.normal(kk1, (B2, H2, Lq2, D2), dtype=jnp.float32)
    k2 = jax.random.normal(kk2, (B2, H2, Lk2, D2), dtype=jnp.float32)
    v2 = jax.random.normal(kk3, (B2, H2, Lk2, D2), dtype=jnp.float32)
    kp_mask = (jnp.arange(Lk2) < 700).astype(jnp.int32).reshape(1, 1, 1, Lk2)

    ref_out2, ref_attn2 = _reference(q2, k2, v2, temperature2, mask=kp_mask)

    out2, attn2 = scaled_dot_product_attention(q2, k2, v2, temperature2, mask=kp_mask)
    jax.block_until_ready((out2, attn2))
    assert jnp.allclose(out2, ref_out2, atol=1e-2, rtol=1e-2)
    assert jnp.allclose(attn2, ref_attn2, atol=1e-4, rtol=1e-4)

    out2_fast, _ = scaled_dot_product_attention(
        q2, k2, v2, temperature2, mask=kp_mask, return_attn=False)
    jax.block_until_ready(out2_fast)
    assert jnp.allclose(out2_fast, ref_out2, atol=1e-2, rtol=1e-2)

    print("KERNEL_OK")
</pallas_src>

<mosaic_0001>
module attributes {stable_mosaic.version = 11 : i64} {
  func.func @_flash_fwd_kernel(%arg0: i32, %arg1: i32, %arg2: i32, %arg3: memref<1x8x16xf32, #tpu.memory_space<vmem>>, %arg4: memref<1x8x16xf32, #tpu.memory_space<vmem>>, %arg5: memref<1x8x16xf32, #tpu.memory_space<vmem>>, %arg6: memref<1x8x8xi8, #tpu.memory_space<vmem>>, %arg7: memref<1x8x16xf32, #tpu.memory_space<vmem>>, %arg8: memref<1x8x1xf32, #tpu.memory_space<vmem>>, %arg9: memref<8x1xf32, #tpu.memory_space<vmem>>, %arg10: memref<8x1xf32, #tpu.memory_space<vmem>>, %arg11: memref<8x16xf32, #tpu.memory_space<vmem>>) attributes {dimension_semantics = [#tpu.dimension_semantics<parallel>, #tpu.dimension_semantics<parallel>, #tpu.dimension_semantics<arbitrary>], iteration_bounds = array<i64: 4, 1, 1>, scalar_prefetch = 0 : i64, scratch_operands = 3 : i64, tpu.core_type = #tpu.core_type<tc>, window_params = [{transform_indices = @transform_0, window_bounds = array<i64: 1, 8, 16>}, {transform_indices = @transform_1, window_bounds = array<i64: 1, 8, 16>}, {transform_indices = @transform_2, window_bounds = array<i64: 1, 8, 16>}, {transform_indices = @transform_3, window_bounds = array<i64: 1, 8, 8>}, {transform_indices = @transform_4, window_bounds = array<i64: 1, 8, 16>}, {transform_indices = @transform_5, window_bounds = array<i64: 1, 8, 1>}]} {
    %c0_i32 = arith.constant 0 : i32
    %0 = arith.cmpi eq, %arg2, %c0_i32 : i32
    %1 = arith.extui %0 : i1 to i32
    %c0_i32_0 = arith.constant 0 : i32
    %2 = arith.cmpi ne, %1, %c0_i32_0 : i32
    scf.if %2 {
      %cst_31 = arith.constant 0xFF800000 : f32
      %43 = vector.broadcast %cst_31 : f32 to vector<8x1xf32>
      %c0_32 = arith.constant 0 : index
      %c0_33 = arith.constant 0 : index
      %44 = vector.load %arg9[%c0_32, %c0_33] : memref<8x1xf32, #tpu.memory_space<vmem>>, vector<8x1xf32>
      tpu.vector_store %arg9[%c0_32, %c0_33], %43 {strides = array<i32>} : memref<8x1xf32, #tpu.memory_space<vmem>>, vector<8x1xf32>,
      %cst_34 = arith.constant 0.000000e+00 : f32
      %45 = vector.broadcast %cst_34 : f32 to vector<8x1xf32>
      %c0_35 = arith.constant 0 : index
      %c0_36 = arith.constant 0 : index
      %46 = vector.load %arg10[%c0_35, %c0_36] : memref<8x1xf32, #tpu.memory_space<vmem>>, vector<8x1xf32>
      tpu.vector_store %arg10[%c0_35, %c0_36], %45 {strides = array<i32>} : memref<8x1xf32, #tpu.memory_space<vmem>>, vector<8x1xf32>,
      %cst_37 = arith.constant 0.000000e+00 : f32
      %47 = vector.broadcast %cst_37 : f32 to vector<8x16xf32>
      %c0_38 = arith.constant 0 : index
      %c0_39 = arith.constant 0 : index
      %48 = vector.load %arg11[%c0_38, %c0_39] : memref<8x16xf32, #tpu.memory_space<vmem>>, vector<8x16xf32>
      tpu.vector_store %arg11[%c0_38, %c0_39], %47 {strides = array<i32>} : memref<8x16xf32, #tpu.memory_space<vmem>>, vector<8x16xf32>,
    } else {
    }
    %c0 = arith.constant 0 : index
    %c0_1 = arith.constant 0 : index
    %c0_2 = arith.constant 0 : index
    %3 = vector.load %arg3[%c0, %c0_1, %c0_2] : memref<1x8x16xf32, #tpu.memory_space<vmem>>, vector<1x8x16xf32>
    %4 = vector.shape_cast %3 : vector<1x8x16xf32> to vector<8x16xf32>
    %cst = arith.constant 2.500000e-01 : f32
    %5 = vector.broadcast %cst : f32 to vector<8x16xf32>
    %6 = arith.mulf %4, %5 : vector<8x16xf32>
    %c0_3 = arith.constant 0 : index
    %c0_4 = arith.constant 0 : index
    %c0_5 = arith.constant 0 : index
    %7 = vector.load %arg4[%c0_3, %c0_4, %c0_5] : memref<1x8x16xf32, #tpu.memory_space<vmem>>, vector<1x8x16xf32>
    %8 = vector.shape_cast %7 : vector<1x8x16xf32> to vector<8x16xf32>
    %cst_6 = arith.constant dense<0.000000e+00> : vector<8x8xf32>
    %9 = tpu.matmul %6, %8, %cst_6 {dimension_numbers = #tpu.dot_dimension_numbers<[1], [1], [0], [0], [0, 0, 1, 0], [], []>} : vector<8x16xf32>, vector<8x16xf32>, vector<8x8xf32> -> vector<8x8xf32>
    %c0_7 = arith.constant 0 : index
    %c0_8 = arith.constant 0 : index
    %c0_9 = arith.constant 0 : index
    %10 = vector.load %arg6[%c0_7, %c0_8, %c0_9] : memref<1x8x8xi8, #tpu.memory_space<vmem>>, vector<1x8x8xi8>
    %11 = vector.shape_cast %10 : vector<1x8x8xi8> to vector<8x8xi8>
    %c0_i8 = arith.constant 0 : i8
    %12 = vector.broadcast %c0_i8 : i8 to vector<8x8xi8>
    %13 = arith.cmpi ne, %11, %12 : vector<8x8xi8>
    %cst_10 = arith.constant -1.000000e+09 : f32
    %14 = vector.broadcast %cst_10 : f32 to vector<8x8xf32>
    %15 = arith.select %13, %14, %9 : vector<8x8xi1>, vector<8x8xf32>
    %c0_11 = arith.constant 0 : index
    %c0_12 = arith.constant 0 : index
    %16 = vector.load %arg9[%c0_11, %c0_12] : memref<8x1xf32, #tpu.memory_space<vmem>>, vector<8x1xf32>
    %cst_13 = arith.constant dense<0xFF800000> : vector<8xf32>
    %17 = vector.multi_reduction <maximumf>, %15, %cst_13 [1] : vector<8x8xf32> to vector<8xf32>
    %18 = vector.shape_cast %17 : vector<8xf32> to vector<8x1xf32>
    %19 = arith.maximumf %16, %18 : vector<8x1xf32>
    %20 = arith.subf %16, %19 : vector<8x1xf32>
    %21 = math.exp %20 : vector<8x1xf32>
    %22 = vector.broadcast %19 : vector<8x1xf32> to vector<8x8xf32>
    %23 = arith.subf %15, %22 : vector<8x8xf32>
    %24 = math.exp %23 : vector<8x8xf32>
    %c0_14 = arith.constant 0 : index
    %c0_15 = arith.constant 0 : index
    %25 = vector.load %arg10[%c0_14, %c0_15] : memref<8x1xf32, #tpu.memory_space<vmem>>, vector<8x1xf32>
    %26 = arith.mulf %21, %25 : vector<8x1xf32>
    %cst_16 = arith.constant dense<0.000000e+00> : vector<8xf32>
    %27 = vector.multi_reduction <add>, %24, %cst_16 [1] : vector<8x8xf32> to vector<8xf32>
    %28 = vector.shape_cast %27 : vector<8xf32> to vector<8x1xf32>
    %29 = arith.addf %26, %28 : vector<8x1xf32>
    %c0_17 = arith.constant 0 : index
    %c0_18 = arith.constant 0 : index
    %30 = vector.load %arg10[%c0_17, %c0_18] : memref<8x1xf32, #tpu.memory_space<vmem>>, vector<8x1xf32>
    tpu.vector_store %arg10[%c0_17, %c0_18], %29 {strides = array<i32>} : memref<8x1xf32, #tpu.memory_space<vmem>>, vector<8x1xf32>,
    %c0_19 = arith.constant 0 : index
    %c0_20 = arith.constant 0 : index
    %31 = vector.load %arg11[%c0_19, %c0_20] : memref<8x16xf32, #tpu.memory_space<vmem>>, vector<8x16xf32>
    %32 = vector.broadcast %21 : vector<8x1xf32> to vector<8x16xf32>
    %33 = arith.mulf %32, %31 : vector<8x16xf32>
    %c0_21 = arith.constant 0 : index
    %c0_22 = arith.constant 0 : index
    %c0_23 = arith.constant 0 : index
    %34 = vector.load %arg5[%c0_21, %c0_22, %c0_23] : memref<1x8x16xf32, #tpu.memory_space<vmem>>, vector<1x8x16xf32>
    %35 = vector.shape_cast %34 : vector<1x8x16xf32> to vector<8x16xf32>
    %cst_24 = arith.constant dense<0.000000e+00> : vector<8x16xf32>
    %36 = tpu.matmul %24, %35, %cst_24 {dimension_numbers = #tpu.dot_dimension_numbers<[1], [0], [0], [1], [0, 0, 1, 1], [], []>} : vector<8x8xf32>, vector<8x16xf32>, vector<8x16xf32> -> vector<8x16xf32>
    %37 = arith.addf %33, %36 : vector<8x16xf32>
    %c0_25 = arith.constant 0 : index
    %c0_26 = arith.constant 0 : index
    %38 = vector.load %arg11[%c0_25, %c0_26] : memref<8x16xf32, #tpu.memory_space<vmem>>, vector<8x16xf32>
    tpu.vector_store %arg11[%c0_25, %c0_26], %37 {strides = array<i32>} : memref<8x16xf32, #tpu.memory_space<vmem>>, vector<8x16xf32>,
    %c0_27 = arith.constant 0 : index
    %c0_28 = arith.constant 0 : index
    %39 = vector.load %arg9[%c0_27, %c0_28] : memref<8x1xf32, #tpu.memory_space<vmem>>, vector<8x1xf32>
    tpu.vector_store %arg9[%c0_27, %c0_28], %19 {strides = array<i32>} : memref<8x1xf32, #tpu.memory_space<vmem>>, vector<8x1xf32>,
    %c0_i32_29 = arith.constant 0 : i32
    %40 = arith.cmpi eq, %arg2, %c0_i32_29 : i32
    %41 = arith.extui %40 : i1 to i32
    %c0_i32_30 = arith.constant 0 : i32
    %42 = arith.cmpi ne, %41, %c0_i32_30 : i32
    scf.if %42 {
      %c0_31 = arith.constant 0 : index
      %c0_32 = arith.constant 0 : index
      %43 = vector.load %arg10[%c0_31, %c0_32] : memref<8x1xf32, #tpu.memory_space<vmem>>, vector<8x1xf32>
      %44 = tpu.reciprocal %43 {approx = true} : vector<8x1xf32> -> vector<8x1xf32>
      %c0_33 = arith.constant 0 : index
      %c0_34 = arith.constant 0 : index
      %45 = vector.load %arg11[%c0_33, %c0_34] : memref<8x16xf32, #tpu.memory_space<vmem>>, vector<8x16xf32>
      %46 = vector.broadcast %44 : vector<8x1xf32> to vector<8x16xf32>
      %47 = arith.mulf %45, %46 : vector<8x16xf32>
      %c0_35 = arith.constant 0 : index
      %c0_36 = arith.constant 0 : index
      %c0_37 = arith.constant 0 : index
      %48 = vector.load %arg7[%c0_35, %c0_36, %c0_37] : memref<1x8x16xf32, #tpu.memory_space<vmem>>, vector<1x8x16xf32>
      %49 = vector.shape_cast %48 : vector<1x8x16xf32> to vector<8x16xf32>
      %50 = vector.shape_cast %47 : vector<8x16xf32> to vector<1x8x16xf32>
      tpu.vector_store %arg7[%c0_35, %c0_36, %c0_37], %50 {strides = array<i32>} : memref<1x8x16xf32, #tpu.memory_space<vmem>>, vector<1x8x16xf32>,
      %c0_38 = arith.constant 0 : index
      %c0_39 = arith.constant 0 : index
      %51 = vector.load %arg9[%c0_38, %c0_39] : memref<8x1xf32, #tpu.memory_space<vmem>>, vector<8x1xf32>
      %c0_40 = arith.constant 0 : index
      %c0_41 = arith.constant 0 : index
      %52 = vector.load %arg10[%c0_40, %c0_41] : memref<8x1xf32, #tpu.memory_space<vmem>>, vector<8x1xf32>
      %53 = math.log %52 : vector<8x1xf32>
      %54 = arith.addf %51, %53 : vector<8x1xf32>
      %c0_42 = arith.constant 0 : index
      %c0_43 = arith.constant 0 : index
      %c0_44 = arith.constant 0 : index
      %55 = vector.load %arg8[%c0_42, %c0_43, %c0_44] : memref<1x8x1xf32, #tpu.memory_space<vmem>>, vector<1x8x1xf32>
      %56 = vector.shape_cast %55 : vector<1x8x1xf32> to vector<8x1xf32>
      %57 = vector.shape_cast %54 : vector<8x1xf32> to vector<1x8x1xf32>
      tpu.vector_store %arg8[%c0_42, %c0_43, %c0_44], %57 {strides = array<i32>} : memref<1x8x1xf32, #tpu.memory_space<vmem>>, vector<1x8x1xf32>,
    } else {
    }
    return
  }
  func.func @transform_0(%arg0: i32, %arg1: i32, %arg2: i32) -> (i32, i32, i32) {
    %c0_i32 = arith.constant 0 : i32
    %c0_i32_0 = arith.constant 0 : i32
    return %arg0, %arg1, %c0_i32 : i32, i32, i32
  }
  func.func @transform_1(%arg0: i32, %arg1: i32, %arg2: i32) -> (i32, i32, i32) {
    %c0_i32 = arith.constant 0 : i32
    %c0_i32_0 = arith.constant 0 : i32
    return %arg0, %arg2, %c0_i32 : i32, i32, i32
  }
  func.func @transform_2(%arg0: i32, %arg1: i32, %arg2: i32) -> (i32, i32, i32) {
    %c0_i32 = arith.constant 0 : i32
    %c0_i32_0 = arith.constant 0 : i32
    return %arg0, %arg2, %c0_i32 : i32, i32, i32
  }
  func.func @transform_3(%arg0: i32, %arg1: i32, %arg2: i32) -> (i32, i32, i32) {
    %c0_i32 = arith.constant 0 : i32
    %c0_i32_0 = arith.constant 0 : i32
    return %c0_i32, %arg1, %arg2 : i32, i32, i32
  }
  func.func @transform_4(%arg0: i32, %arg1: i32, %arg2: i32) -> (i32, i32, i32) {
    %c0_i32 = arith.constant 0 : i32
    %c0_i32_0 = arith.constant 0 : i32
    return %arg0, %arg1, %c0_i32 : i32, i32, i32
  }
  func.func @transform_5(%arg0: i32, %arg1: i32, %arg2: i32) -> (i32, i32, i32) {
    %c0_i32 = arith.constant 0 : i32
    %c0_i32_0 = arith.constant 0 : i32
    return %arg0, %arg1, %c0_i32 : i32, i32, i32
  }
}

</mosaic_0001>

<bundles_post_ra>
// kernel: tpu_custom_call.1
= control target key start
LH: loop header
LB: loop body
LE: loop exit
PB: predicated region body
PF: predicated region fallthrough
CT: control target
= control target key end

     0   :  { %s1438_s0 = inlined_call_operand.hbm [shape: f32[4,8,16], index: 0, kind: input, shape index: {}]   ;;  %s1439_s1 = inlined_call_operand.hbm [shape: f32[4,8,16], index: 1, kind: input, shape index: {}]   ;;  %s1440_s2 = inlined_call_operand.hbm [shape: f32[4,8,16], index: 2, kind: input, shape index: {}]   ;;  %s1441_s3 = inlined_call_operand.vmem [shape: s8[1,8,8], index: 3, kind: input, shape index: {}]   ;;  %s1442_s4 = inlined_call_operand.hbm [shape: f32[4,8,16], index: 4, kind: output, shape index: {0}]   ;;  %s1443_s5 = inlined_call_operand.vmem [shape: f32[4,8,1], index: 5, kind: output, shape index: {1}]  }
   0x1   :  { %1452 = sst [smem:[#allocation20_spill]] %s1439_s1 }
   0x2   :  { %11 = vsyncpa [#allocation6], 0 }
   0x3   :  { %13 = vsyncpa [#allocation6 + $0x1], 0 }
   0x4   :  { %14 = vsyncpa [#allocation9], 0 }
   0x5   :  { %16 = vsyncpa [#allocation9 + $0x1], 0 }
   0x6   :  { %17 = vsyncpa [#allocation7], 0 }
   0x7   :  { %19 = vsyncpa [#allocation7 + $0x1], 0  ;;  %s1155_s18 = smov 0   ;;  %s1157_s19 = smov 0  }
   0x8   :  { %s1159_s20 = smov 0   ;;  %s1161_s21 = smov 0  }
   0x9   :  { %s1163_s22 = smov 0   ;;  %s1165_s23 = smov 0  }
   0xa LB: > { %1453 = sst [smem:[#allocation15_spill]] %s1095_s18  ;;  %s1186_s24 = sadd.s32 4294967295, %s1115_s23   ;;  %s1115_s23 = sphi %s1165_s23, %s25_s23   ;;  %s1111_s22 = sphi %s1163_s22, %s1478_s22   ;;  %s1107_s21 = sphi %s1161_s21, %s1477_s21   ;;  %s1103_s20 = sphi %s1159_s20, %s1481_s20   ;;  %s1099_s19 = sphi %s1157_s19, %s1480_s19   ;;  %s1095_s18 = sphi %s1155_s18, %s1479_s18  }
   0xb   : > { %1454 = sst [smem:[#allocation16_spill]] %s1111_s22  ;;  %s816_s25 = sadd.s32 4294967294, %s1115_s23  }
   0xc   : > { %s44_s26 = sadd.s32 1, %s1111_s22  ;;  %s53_s27 = sadd.s32 1, %s1103_s20 }
   0xd   : > { %p46_p0 = scmp.ge.s32.totalorder %s44_s26, 4  ;;  %p60_p1 = scmp.ne.s32.totalorder %s1103_s20, %s1099_s19 }
   0xe   : > { %p61_p2 = scmp.eq.s32.totalorder %s1115_s23, 0  ;;  %p66_p3 = scmp.ne.s32.totalorder %s1099_s19, %s1095_s18 }
   0xf   : > { %s1483_s26 = smov (%p46_p0, %s44_s26), 0  ;;  %p67_p5 = scmp.eq.s32.totalorder %s1186_s24, 0 }
  0x10   : > { %1455 = sst [smem:[#allocation17_spill]] %s1483_s26  ;;  %p1198_p4 = por %p61_p2, %p60_p1 }
  0x11   : > { %s48_s29 = ssub.s32 %s1111_s22, %s1483_s26  ;;  %p176_p6 = scmp.eq.s32.totalorder %s1186_s24, 3 }
  0x12   : > { %p51_p7 = scmp.eq.s32.totalorder %s48_s29, 0  ;;  %p1206_p8 = por %p67_p5, %p66_p3 }
  0x13   : > { %p1210_p9 = por %p176_p6, %p60_p1  ;;  %p182_p10 = scmp.eq.s32.totalorder %s816_s25, 3 }
  0x14   : > { %s1457_s30 = scalar_select %p1206_p8, 1, 0 }
  0x15   : > { %s1458_s6 = scalar_select %p1210_p9, 1, 0 }
  0x16   : > { %s1215_s7 = scalar_select %p51_p7, %s1103_s20, %s53_s27  }
  0x17   : > { %p1217_p11 = por %p182_p10, %p66_p3  ;;  %p875_p12 = scmp.lt.s32.totalorder %s1115_s23, 4 }
  0x18   : > { %1459 = sst [smem:[#allocation18_spill]] %s1215_s7  ;;  %s1444_s9 = sand.u32 1, %s1103_s20  }
  0x19   : > { %s1460_s8 = scalar_select %p1217_p11, 1, 0 }
  0x1a   : > { %s1225_s10 = sshll.u32 %s1444_s9, 3  ;;  %s1228_s11 = sshll.u32 %s1111_s22, 7 }
  0x1b   : > { %1461 = sst [smem:[#allocation19_spill]] %s1460_s8  ;;  %p1232_p13 = pnand %p875_p12, %p1198_p4 }
  0x1c   : > { %s259_s13 = sand.u32 1, %s1115_s23   ;;  %s1463_s1 = sld [smem:[#allocation20_spill]] }
  0x1d   : > { %s1462_s12 = scalar_select %p1232_p13, 1, 0 }
  0x1e   : > { %s263_s17 = scalar_lea.vmem [#allocation8], %s1225_s10  ;;  %s1248_s27 = scalar_lea.sflag [#allocation9], %s259_s13 }
  0x1f   : > { %s271_s25 = sshll.u32 %s263_s17, 4  ;;  %p1254_p3 = pneg %p1232_p13  ;;  %s1245_s25 = int_to_ptr.vmem [resolvable:$true] %s271_s25 }
  0x22   : > { %s1241_s16 = scalar_lea.hbm %s1463_s1, %s1228_s11  ;;  %s944_s17 = scalar_lea.hbm %s1463_s1, 512 }
  0x23   : > { %s939_s28 = scalar_lea.hbm %s1241_s16, 128  ;;  %p945_p6 = scmp.lt.u32.totalorder %s1241_s16, %s1463_s1 }
  0x24   : > { %p940_p2 = scmp.ne.s32.totalorder %s1241_s16, %s939_s28  ;;  %p946_p7 = scmp.lt.u32.totalorder %s944_s17, %s939_s28 }
  0x25   : > { %p948_p12 = scmp.lt.u32.totalorder %s939_s28, %s1241_s16 }
  0x26   : > { %p942_p4 = pnand %p1254_p3, %p940_p2  ;;  %p947_p10 = por %p946_p7, %p945_p6 }
  0x28   : > { %p943_p5 = pneg %p942_p4  ;;  %p949_p0 = por %p948_p12, %p947_p10 }
  0x2a   : > { %p950_p1 = pnand %p949_p0, %p943_p5 }
  0x2c   : > { %953 = shalt.err (!%p950_p1)
}
  0x2d   : > { %s954_s13 = scalar_lea.vmem %s1245_s25, 128  ;;  %s1117_s14 = smov [#allocation8]  }
  0x2e   : > { %p955_p2 = scmp.ne.s32.totalorder %s1245_s25, %s954_s13  ;;  %s959_s15 = sshll.u32 %s1117_s14, 4  ;;  %s960_s15 = int_to_ptr.vmem [resolvable:$false] %s959_s15 }
  0x2f   : > { %s961_s26 = scalar_lea.vmem %s960_s15, 256  ;;  %p962_p9 = scmp.lt.s32.totalorder %s1245_s25, %s960_s15 }
  0x30   : > { %p957_p4 = pnand %p955_p2, %p1254_p3  ;;  %p963_p8 = scmp.lt.s32.totalorder %s961_s26, %s954_s13 }
  0x32   : > { %p958_p11 = pneg %p957_p4  ;;  %p964_p6 = por %p963_p8, %p962_p9 }
  0x34   : > { %p965_p7 = pnand %p964_p6, %p958_p11 }
  0x36   : > { %968 = shalt.err (!%p965_p7)
}
  0x37   : > { %867 = dma.hbm_to_vmem [thread:$0]  (!%p1232_p13), %s1241_s16, 128, %s1245_s25, %s1248_s27  }
  0x38   : > { %p1465_p0 = scmp.lt.s32.totalorder %s1115_s23, 5  ;;  %p1466_p1 = scmp.ge.s32.totalorder %s1115_s23, 1 }
  0x39   : > { %s1290_s13 = scalar_lea.hbm %s1438_s0, %s1228_s11  ;;  %s244_s14 = scalar_lea.vmem [#allocation5], %s1225_s10 }
  0x3a   : > { %p1282_p5 = pnand %p1466_p1, %p1465_p0  ;;  %s252_s15 = sshll.u32 %s244_s14, 4  ;;  %s1293_s15 = int_to_ptr.vmem [resolvable:$true] %s252_s15 }
  0x3b   : > { %s1299_s26 = scalar_lea.hbm %s1440_s2, %s1228_s11  ;;  %s1468_s1 = sand.u32 1, %s1103_s20  }
  0x3c   : > { %s1467_s9 = scalar_select %p1282_p5, 1, 0 }
  0x3d   : > { %s241_s22 = scalar_lea.sflag [#allocation6], %s1468_s1  ;;  %s969_s7 = scalar_lea.hbm %s1290_s13, 128 }
  0x3e   : > { %p970_p8 = scmp.ne.s32.totalorder %s1290_s13, %s969_s7  ;;  %s974_s8 = scalar_lea.hbm %s1438_s0, 512 }
  0x3f   : > { %p975_p10 = scmp.lt.u32.totalorder %s1290_s13, %s1438_s0  ;;  %p976_p12 = scmp.lt.u32.totalorder %s974_s8, %s969_s7 }
  0x40   : > { %p972_p9 = pnand %p970_p8, %p1254_p3  ;;  %p978_p4 = scmp.lt.u32.totalorder %s969_s7, %s1290_s13 }
  0x41   : > { %p977_p2 = por %p976_p12, %p975_p10 }
  0x42   : > { %p973_p11 = pneg %p972_p9 }
  0x43   : > { %p979_p6 = por %p978_p4, %p977_p2 }
  0x45   : > { %p980_p7 = pnand %p979_p6, %p973_p11 }
  0x47   : > { %983 = shalt.err (!%p980_p7)
}
  0x48   : > { %s984_s1 = scalar_lea.vmem %s1293_s15, 128  ;;  %s1118_s11 = smov [#allocation5]  }
  0x49   : > { %p985_p0 = scmp.ne.s32.totalorder %s1293_s15, %s984_s1  ;;  %s989_s16 = sshll.u32 %s1118_s11, 4  ;;  %s990_s16 = int_to_ptr.vmem [resolvable:$false] %s989_s16 }
  0x4a   : > { %s991_s18 = scalar_lea.vmem %s990_s16, 256  ;;  %p992_p9 = scmp.lt.s32.totalorder %s1293_s15, %s990_s16 }
  0x4b   : > { %p987_p1 = pnand %p985_p0, %p1254_p3  ;;  %p993_p5 = scmp.lt.s32.totalorder %s991_s18, %s984_s1 }
  0x4d   : > { %p988_p8 = pneg %p987_p1  ;;  %p994_p10 = por %p993_p5, %p992_p9 }
  0x4f   : > { %p995_p12 = pnand %p994_p10, %p988_p8 }
  0x51   : > { %998 = shalt.err (!%p995_p12)
}
  0x52   : > { %864 = dma.hbm_to_vmem [thread:$0]  (!%p1232_p13), %s1290_s13, 128, %s1293_s15, %s241_s22  }
  0x53   : > { %s282_s7 = scalar_lea.vmem [#allocation10], %s1225_s10  ;;  %s999_s25 = scalar_lea.hbm %s1299_s26, 128 }
  0x54   : > { %s290_s8 = sshll.u32 %s282_s7, 4  ;;  %p1000_p11 = scmp.ne.s32.totalorder %s1299_s26, %s999_s25  ;;  %s291_s8 = int_to_ptr.vmem [resolvable:$true] %s290_s8 }
  0x55   : > { %s1004_s14 = scalar_lea.hbm %s1440_s2, 512  ;;  %p1005_p4 = scmp.lt.u32.totalorder %s1299_s26, %s1440_s2 }
  0x56   : > { %p1002_p5 = pnand %p1000_p11, %p1254_p3  ;;  %p1006_p6 = scmp.lt.u32.totalorder %s1004_s14, %s999_s25 }
  0x57   : > { %p1008_p0 = scmp.lt.u32.totalorder %s999_s25, %s1299_s26 }
  0x58   : > { %p1003_p2 = pneg %p1002_p5  ;;  %p1007_p7 = por %p1006_p6, %p1005_p4 }
  0x5a   : > { %p1009_p1 = por %p1008_p0, %p1007_p7 }
  0x5c   : > { %p1010_p8 = pnand %p1009_p1, %p1003_p2 }
  0x5e   : > { %1013 = shalt.err (!%p1010_p8)
}
  0x5f   : > { %s1014_s22 = scalar_lea.vmem %s291_s8, 128  ;;  %s1119_s10 = smov [#allocation10]  }
  0x60   : > { %p1015_p9 = scmp.ne.s32.totalorder %s291_s8, %s1014_s22  ;;  %s1019_s13 = sshll.u32 %s1119_s10, 4  ;;  %s1020_s13 = int_to_ptr.vmem [resolvable:$false] %s1019_s13 }
  0x61   : > { %s1021_s15 = scalar_lea.vmem %s1020_s13, 256  ;;  %p1022_p11 = scmp.lt.s32.totalorder %s291_s8, %s1020_s13 }
  0x62   : > { %p1017_p10 = pnand %p1015_p9, %p1254_p3  ;;  %p1023_p5 = scmp.lt.s32.totalorder %s1021_s15, %s1014_s22 }
  0x64   : > { %p1018_p12 = pneg %p1017_p10  ;;  %p1024_p13 = por %p1023_p5, %p1022_p11 }
  0x66   : > { %p1025_p4 = pnand %p1024_p13, %p1018_p12 }
  0x68   : > { %1028 = shalt.err (!%p1025_p4)
}
  0x69   : > { %p1469_p6 = scmp.ne.s32.totalorder %s1462_s12, 0  ;;  %p1470_p2 = scmp.ne.s32.totalorder %s1467_s9, 0 }
  0x6a   : > { %s1346_s29 = sand.u32 (!%p1470_p2), 1, %s1099_s19   ;;  %p1471_p13 = scmp.ne.s32.totalorder (!%p1470_p2), %s1457_s30, 0 }
  0x6b   : > { %870 = dma.hbm_to_vmem [thread:$0]  (!%p1469_p6), %s1299_s26, 128, %s291_s8, %s1248_s27  }
  0x6c   : > { %299 = sbr.rel (%p1470_p2) target bundleno = 935 (0x3a7), region = 36  ;;  %s1349_s16 = sshll.u32 (!%p1470_p2), %s1346_s29, 3 }
  0x6d   : > { %s302_s18 = scalar_lea.sflag (!%p1470_p2), [#allocation6], %s1346_s29  ;;  %s305_s7 = scalar_lea.vmem (!%p1470_p2), [#allocation5], %s1349_s16 }
  0x73   : > { %1082 = dma.done.wait (%p1471_p13), %s302_s18, 128  }
  0x74   : > { %1084 = vsyncadd (%p1471_p13), %s302_s18, 4294967168  ;;  %s310_s12 = sand.u32 1, %s1186_s24   ;;  %s314_s9 = scalar_lea.vmem [#allocation8], %s1349_s16 }
  0x75   : > { %s311_s27 = scalar_lea.sflag [#allocation9], %s310_s12 }
  0x76   : > { %1086 = dma.done.wait (%p1471_p13), %s311_s27, 256  }
  0x77   : > { %1088 = vsyncadd (%p1471_p13), %s311_s27, 4294967040  ;;  %vm397_vm0 = vcmask 130048   ;;  %v1120_v0 = vmov 0.0   ;;  %vm1121_vm1 = vmmov 0   ;;  %v401_v1 = vld [vmem:[%s314_s9] sm:$0xff]  ;;  %v399_v2 = vld [vmem:[%s305_s7] sm:$0xff] }
  0x78   : > { %843 = vmatprep.subr.mxu0 %v1120_v0  ;;  %398 = vst.msk [vmem:[#allocation4] sm:$0xff] %vm397_vm0, %v1120_v0  ;;  %845 = vmatprep.mubr.msk.f32.mxu0 %vm1121_vm1, %v1120_v0  ;;  %v400_v3 = vmul.f32 0.25, %v399_v2  ;;  %v1122_v4 = vmov 0   ;;  %vm394_vm2 = vcmask 7168   ;;  %v1123_v5 = vmov -inf   ;;  %s323_s26 = scalar_lea.vmem [#allocation10], %s1349_s16 }
  0x79   : > { %848 = vmatprep.subr.mxu1 %v1120_v0  ;;  %850 = vmatprep.mubr.msk.f32.mxu1 %vm1121_vm1, %v1120_v0  ;;  %395 = vst.msk [vmem:[#allocation2] sm:$0xff] %vm394_vm2, %v1123_v5  ;;  %396 = vst.msk [vmem:[#allocation3] sm:$0xff] %vm394_vm2, %v1120_v0  ;;  %v479_v6 = vld [vmem:[%s1441_s3] sm:$0x3]  ;;  %vm486_vm5 = vcmask 64512   ;;  %p381_p3 = scmp.lt.s32.totalorder %s1107_s21, 3 }
  0x7a   : > { %844 = vmatpush3.xpose.msk.msra.mxu0 %vm397_vm0, %v401_v1  ;;  %929 = vset.pattern.permute.xlu0 %v1122_v4  ;;  %vm480_vm3 = vnez %v479_v6  ;;  %v517_v17 = vld [vmem:[%s323_s26] sm:$0xff]  ;;  %s836_s1 = sshll.u32 %s1107_s21, 7  ;;  %s364_s11 = scalar_lea.vmem [#allocation11], %s1349_s16 }
  0x7b   : > { %930 = vset.pattern.permute.xlu1 %v1122_v4  ;;  %v481_v7 = vsel %vm480_vm3, 16843009, %v1122_v4  ;;  %849 = vmatpush3.msra.mxu1 %v517_v17  ;;  %s382_s8 = scalar_select %p381_p3, %s1107_s21, 3 }
  0x7c   : > { %v482_v8 = vunpack.c.0.s8 %v481_v7  ;;  %s635_s22 = sshll.u32 %s364_s11, 4  ;;  %s1389_s15 = scalar_lea.hbm %s1442_s4, %s836_s1  ;;  %s1391_s22 = int_to_ptr.vmem [resolvable:$true] %s635_s22 }
  0x7d   : > { %846 = vmatmul.mubr.msk.f32.vlgmr.msra.gmra.mrb[0].mxu0 %vm397_vm0, %v400_v3  ;;  %s831_s25 = sshll.u32 %s382_s8, 3  ;;  %s614_s18 = scalar_lea.sflag [#allocation7], %s1346_s29 }
  0x7e   : > { %vm483_vm4 = vcmp.ne.s32.totalorder %v482_v8, 0  ;;  %s387_s14 = scalar_lea.vmem %s1443_s5, %s831_s25  ;;  %s1029_s7 = scalar_lea.vmem %s1391_s22, 128 }
  0x7f   : > { %v510_v35 = vld [vmem:[#allocation4] sm:$0xff]  ;;  %p1030_p7 = scmp.ne.s32.totalorder %s1391_s22, %s1029_s7  ;;  %p1472_p0 = scmp.ne.s32.totalorder %s1458_s6, 0 }
  0x80   : > { %v485_v13 = vld [vmem:[#allocation2] sm:$0xff]  ;;  %v502_v25 = vld [vmem:[#allocation3] sm:$0xff]  ;;  %s1124_s21 = smov [#allocation11]  }
  0x81   : > { %p1031_p1 = pnand %p1030_p7, %p1472_p0  ;;  %s1033_s16 = sshll.u32 %s1124_s21, 4  ;;  %s1034_s16 = int_to_ptr.vmem [resolvable:$false] %s1033_s16 }
  0x82   : > { %s1035_s12 = scalar_lea.vmem %s1034_s16, 256  ;;  %p1036_p9 = scmp.lt.s32.totalorder %s1391_s22, %s1034_s16 }
  0x83   : > { %p1032_p8 = pneg %p1031_p1  ;;  %p1037_p10 = scmp.lt.s32.totalorder %s1035_s12, %s1029_s7 }
  0x85   : > { %p1038_p12 = por %p1037_p10, %p1036_p9 }
  0x87   : > { %p1039_p11 = pnand %p1038_p12, %p1032_p8 }
 0x150   : > { %v475_v9 = vpop.f32.mrb[0].mxu0 }
 0x151   : > { %v484_v10 = vsel %vm483_vm4, -1e+09, %v475_v9  ;;  %v847_v11 = vpop.f32.mrb[1].mxu0 }
 0x152   : > { %v487_v12 = vsel %vm486_vm5, %v484_v10, -inf }
 0x153   : > { %488 = vmax.xlane.f32.xlu0 %v487_v12 }
 0x1e0   : > { %v489_v14 = vpop.xlane.xlu0 %488 }
 0x1e1   : > { %v490_v15 = vmax.f32 %v485_v13, %v489_v14 }
 0x1e3   : > { %v491_v16 = vsub.f32 %v485_v13, %v490_v15  ;;  %593 = vst.msk [vmem:[#allocation2] sm:$0xff] %vm394_vm2, %v490_v15  ;;  %496 = vperm.xlu0 %929, %v490_v15  }
 0x1e5   : > { %v492_v23 = vmul.f32 1.442695, %v491_v16 }
 0x1ea   : > { %v607_v33 = vld [vmem:[#allocation2] sm:$0xff] }
 0x262   : > { %v497_v18 = vpop.permute.xlu0 %496 }
 0x263   : > { %v499_v19 = vsub.f32 %v484_v10, %v497_v18 }
 0x265   : > { %v500_v20 = vmul.f32 1.442695, %v499_v19 }
 0x267   : > { %931 = vpow2.f32 %v500_v20 }
 0x268   : > { %933 = vpow2.f32 %v492_v23 }
 0x271   : > { %v932_v21 = vpop.eup %931 }
 0x272   : > { %851 = vmatmul.mubr.msk.f32.vlgmr.msra.gmra.mrb[0].mxu1 %vm486_vm5, %v932_v21  ;;  %v504_v22 = vsel %vm486_vm5, %v932_v21, 0.0  ;;  %v934_v24 = vpop.eup %933 }
 0x273   : > { %505 = vadd.xlane.f32.xlu1 %v504_v22  ;;  %v503_v26 = vmul.f32 %v934_v24, %v502_v25 }
 0x284   : > { %513 = vperm.xlu1 %930, %v934_v24  }
 0x300   : > { %v506_v27 = vpop.xlane.xlu1 %505 }
 0x301   : > { %v507_v28 = vadd.f32 %v506_v27, %v503_v26 }
 0x303   : > { %509 = vst.msk [vmem:[#allocation3] sm:$0xff] %vm394_vm2, %v507_v28 }
 0x304   : > { %v514_v36 = vpop.permute.xlu1 %513 }
 0x305   : > { %v516_v37 = vmul.f32 %v514_v36, %v510_v35 }
 0x30a   : > { %v608_v29 = vld [vmem:[#allocation3] sm:$0xff] }
 0x30b   : > { %935 = vlog2.f32 %v608_v29 }
 0x30c   : > { %937 = vrcp.f32 %v608_v29 }
 0x315   : > { %v936_v30 = vpop.eup %935 }
 0x316   : > { %v938_v31 = vpop.eup %937  ;;  %v610_v32 = vmul.f32 0.6931472, %v936_v30 }
 0x317   : > { %602 = vperm.xlu1 %930, %v938_v31  }
 0x318   : > { %v611_v34 = vadd.f32 %v610_v32, %v607_v33 }
 0x31a   : > { %612 = vst.msk [vmem:[%s387_s14] sm:$0xff] %vm394_vm2, %v611_v34 }
 0x345   : > { %v587_v38 = vpop.f32.mrb[0].mxu1 }
 0x346   : > { %v591_v39 = vadd.f32 %v587_v38, %v516_v37  ;;  %v852_v40 = vpop.f32.mrb[1].mxu1 }
 0x348   : > { %592 = vst.msk [vmem:[#allocation4] sm:$0xff] %vm397_vm0, %v591_v39 }
 0x34f   : > { %v599_v41 = vld [vmem:[#allocation4] sm:$0xff] }
 0x396   : > { %v603_v42 = vpop.permute.xlu1 %602 }
 0x397   : > { %v605_v43 = vmul.f32 %v603_v42, %v599_v41 }
 0x399   : > { %606 = vst.msk [vmem:[%s364_s11] sm:$0xff] %vm397_vm0, %v605_v43 }
 0x39a   : > { %1042 = shalt.err (!%p1039_p11)
}
 0x39b   : > { %s1043_s29 = scalar_lea.hbm %s1389_s15, 128  ;;  %s1047_s24 = scalar_lea.hbm %s1442_s4, 512 }
 0x39c   : > { %p1044_p5 = scmp.ne.s32.totalorder %s1389_s15, %s1043_s29  ;;  %p1048_p2 = scmp.lt.u32.totalorder %s1389_s15, %s1442_s4 }
 0x39d   : > { %p1049_p13 = scmp.lt.u32.totalorder %s1047_s24, %s1043_s29  ;;  %p1051_p7 = scmp.lt.u32.totalorder %s1043_s29, %s1389_s15 }
 0x39e   : > { %p1045_p4 = pnand %p1044_p5, %p1472_p0 }
 0x39f   : > { %p1050_p3 = por %p1049_p13, %p1048_p2 }
 0x3a0   : > { %p1046_p6 = pneg %p1045_p4 }
 0x3a1   : > { %p1052_p1 = por %p1051_p7, %p1050_p3 }
 0x3a3   : > { %p1053_p8 = pnand %p1052_p1, %p1046_p6 }
 0x3a5   : > { %1056 = shalt.err (!%p1053_p8)
}
 0x3a6   : > { %859 = dma.vmem_to_hbm [thread:$0]  (%p1472_p0), %s1391_s22, 128, %s1389_s15, %s614_s18  }
 0x3a7 PF: > { %s1473_s8 = sld [smem:[#allocation15_spill]]  ;;  %s1474_s25 = sld [smem:[#allocation19_spill]] }
 0x3a8   : > { %p876_p9 = scmp.ge.s32.totalorder %s1115_s23, 2 }
 0x3ad   : > { %s650_s28 = sand.u32 1, %s1473_s8   ;;  %p1475_p10 = scmp.ne.s32.totalorder %s1474_s25, 0 }
 0x3ae   : > { %s651_s17 = scalar_lea.sflag [#allocation7], %s650_s28 }
 0x3af   : > { %p872_p12 = pnand %p876_p9, %p1475_p10 }
 0x3b1   : > { %1090 = dma.done.wait (!%p872_p12), %s651_s17, 128  }
 0x3b2   : > { %1092 = vsyncadd (!%p872_p12), %s651_s17, 4294967168  ;;  %s25_s23 = sadd.s32 1, %s1115_s23   ;;  %s1476_s6 = sld [smem:[#allocation18_spill]] }
 0x3b3   : > { %p22_p11 = scmp.ge.s32.totalorder %s25_s23, 6   ;;  %s1477_s21 = sld [smem:[#allocation16_spill]] }
 0x3b4   : > { %s1478_s22 = sld [smem:[#allocation17_spill]]  ;;  %s1479_s18 = smov %s1099_s19 }
 0x3b5   : > { %s1480_s19 = smov %s1103_s20  ;;  %24 = sbr.rel (!%p22_p11) target bundleno = 10 (0xa), region = 128 }
 0x3b8   : > { %s1481_s20 = smov %s1476_s6 }
 0x3bc   :  { %666 = vsyncpa [#allocation6], 1 }
 0x3bd   :  { %668 = vsyncpa [#allocation6 + $0x1], 1 }
 0x3be   :  { %669 = vsyncpa [#allocation9], 1 }
 0x3bf   :  { %671 = vsyncpa [#allocation9 + $0x1], 1 }
 0x3c0   :  { %672 = vsyncpa [#allocation7], 1 }
 0x3c1   :  { %674 = vsyncpa [#allocation7 + $0x1], 1 }

</bundles_post_ra>
